<compile_context>
chip_gen: v7x
topology: tpu7x:2x2x1
jax: 0.10.0
libtpu: 0.0.40
codegen_flags: <defaults>
</compile_context>

<pallas_src>
import functools

import jax
import jax.numpy as jnp
from jax import lax
from jax.experimental import pallas as pl
from jax.experimental.pallas import tpu as pltpu

EPS = 1e-5


# ------------------------------- kernel ------------------------------------

def _resblock_kernel(x_ref, wt1_ref, b1_ref, wt2_ref, b2_ref, out_ref):
    # x_ref   : (1, H, L)  bf16   P images packed along lanes, L = P*W*C
    #                             (also the identity residual)
    # wt1_ref : (3L, L)    bf16   conv1 weight (BN1 scale folded), block-diag
    #                             Toeplitz; rows = (ky, p, w_in, cin)
    # b1_ref  : (1, L)     f32    BN1 bias, tiled along (p, w)
    # wt2_ref : (3L, L)    bf16   conv2 weight (BN2 scale folded)
    # b2_ref  : (1, L)     f32
    # out_ref : (1, H, L)  f32
    x = x_ref[0]                                   # (H, L) bf16
    L = x.shape[1]

    def conv3x3(a, wt_ref):
        # SAME 3x3 conv as 3 accumulating MXU matmuls (one per ky tap) against
        # row-shifted copies of `a`; the kx taps / SAME padding along W live
        # inside the Toeplitz weight.  Zero halo at the image top/bottom.
        z = jnp.zeros((1, L), a.dtype)
        up = jnp.concatenate([z, a[:-1, :]], axis=0)   # row h sees a[h-1] (ky=0)
        dn = jnp.concatenate([a[1:, :], z], axis=0)    # row h sees a[h+1] (ky=2)
        acc = jnp.dot(up, wt_ref[0:L, :], preferred_element_type=jnp.float32)
        acc = acc + jnp.dot(a, wt_ref[L:2 * L, :],
                            preferred_element_type=jnp.float32)
        acc = acc + jnp.dot(dn, wt_ref[2 * L:3 * L, :],
                            preferred_element_type=jnp.float32)
        return acc                                      # (H, L) f32

    # conv1 + BN1 + ReLU
    out1 = jnp.maximum(conv3x3(x, wt1_ref) + b1_ref[...], 0.0)
    # conv2 + BN2 + identity residual + ReLU  (residual add in f32)
    acc2 = conv3x3(out1.astype(jnp.bfloat16), wt2_ref)
    y = acc2 + b2_ref[...] + x.astype(jnp.float32)
    out_ref[0] = jnp.maximum(y, 0.0).astype(out_ref.dtype)


# -------------------------- one-time weight prep ----------------------------

def _row_toeplitz(w_hwio, width):
    """Unroll the kx (width) axis of a KHxKW HWIO conv weight into a
    block-Toeplitz matrix (KH*width*Cin, width*Cout) so a SAME-padded 1-D conv
    along W becomes a plain matmul.  Row = (ky, w_in, cin), col = (w_out, cout)."""
    KH, KW, Cin, Cout = w_hwio.shape
    wi = jnp.arange(width)[:, None]                     # input column
    wo = jnp.arange(width)[None, :]                     # output column
    kx = wi - wo + (KW // 2)                            # tap index (SAME pad)
    valid = (kx >= 0) & (kx < KW)
    blocks = w_hwio[:, jnp.clip(kx, 0, KW - 1), :, :]   # (KH, Wi, Wo, Cin, Cout)
    blocks = jnp.where(valid[None, :, :, None, None], blocks, 0.0)
    blocks = jnp.transpose(blocks, (0, 1, 3, 2, 4))     # (KH, Wi, Cin, Wo, Cout)
    return blocks.reshape(KH * width * Cin, width * Cout)


def _packed_toeplitz(w_hwio, width, pack):
    """Block-diagonal (over the `pack` images sharing the lane axis) Toeplitz
    weight: rows = (ky, p, w_in, cin), cols = (p, w_out, cout)."""
    KH, KW, Cin, Cout = w_hwio.shape
    wt = _row_toeplitz(w_hwio, width).reshape(KH, width * Cin, width * Cout)
    eye = jnp.eye(pack, dtype=wt.dtype)
    blk = jnp.einsum("kac,pq->kpaqc", wt, eye)          # (KH, P, WCin, P, WCout)
    return blk.reshape(KH * pack * width * Cin, pack * width * Cout)


def prepare_residual_block(params, width, pack):
    """Run ONCE per weight update: fold eval-mode BN into the conv weights,
    build the packed block-Toeplitz matrices and the lane-tiled biases."""
    s1 = params["gamma1"] * lax.rsqrt(params["var1"] + EPS)
    b1 = params["beta1"] - params["mean1"] * s1
    s2 = params["gamma2"] * lax.rsqrt(params["var2"] + EPS)
    b2 = params["beta2"] - params["mean2"] * s2
    wt1 = _packed_toeplitz(params["w1"] * s1, width, pack).astype(jnp.bfloat16)
    wt2 = _packed_toeplitz(params["w2"] * s2, width, pack).astype(jnp.bfloat16)
    b1t = jnp.tile(b1, pack * width)[None, :].astype(jnp.float32)
    b2t = jnp.tile(b2, pack * width)[None, :].astype(jnp.float32)
    return {"wt1": wt1, "b1": b1t, "wt2": wt2, "b2": b2t}


# ------------------------------- forward -----------------------------------

@functools.partial(jax.jit, static_argnames=("pack",))
def residual_block_pallas(x_nchw, prep, *, pack):
    """x_nchw: (N, C, H, W) f32; shortcut=None path (Cin == Cout, stride=1)."""
    N, C, H, W = x_nchw.shape
    assert N % pack == 0, "batch must be divisible by the lane pack factor"
    G = N // pack
    L = pack * W * C

    # NCHW -> lane-packed (G, H, P*W*C), bf16 into the MXU (halves HBM bytes).
    # TODO(synk): hoist this layout change out of the per-layer path in a real net.
    x = jnp.transpose(x_nchw, (0, 2, 3, 1))              # (N, H, W, C)
    x = x.reshape(G, pack, H, W * C)
    x = jnp.transpose(x, (0, 2, 1, 3)).reshape(G, H, L).astype(jnp.bfloat16)

    out = pl.pallas_call(
        _resblock_kernel,
        out_shape=jax.ShapeDtypeStruct((G, H, L), jnp.float32),
        grid_spec=pltpu.PrefetchScalarGridSpec(
            num_scalar_prefetch=0,
            grid=(G,),                 # whole batch in one step when pack == N
            in_specs=[
                pl.BlockSpec((1, H, L), lambda g: (g, 0, 0)),
                # Constant-index weights/biases: DMA'd once, reused across the
                # grid.  (At this size (~200 KB total) multi-buffering cost is
                # irrelevant; mark pipeline_mode=pl.Buffered(1) when C grows.)
                pl.BlockSpec((3 * L, L), lambda g: (0, 0)),
                pl.BlockSpec((1, L), lambda g: (0, 0)),
                pl.BlockSpec((3 * L, L), lambda g: (0, 0)),
                pl.BlockSpec((1, L), lambda g: (0, 0)),
            ],
            out_specs=pl.BlockSpec((1, H, L), lambda g: (g, 0, 0)),
        ),
        compiler_params=pltpu.CompilerParams(
            # Grid extent is 1 for this batch: whole fused batch on one TC
            # (per the v7x review).  Flip to "parallel" when G > 1 and each
            # step's matmul M is big enough to keep a core busy.
            dimension_semantics=("arbitrary",)),
    )(x, prep["wt1"], prep["b1"], prep["wt2"], prep["b2"])

    # (G, H, P, W, C) -> NCHW
    out = out.reshape(G, H, pack, W, C)
    out = jnp.transpose(out, (0, 2, 4, 1, 3)).reshape(N, C, H, W)
    return out.astype(x_nchw.dtype)


# ------------------------------ references ----------------------------------

def residual_block_ref(x_nchw, params):
    """Pure-JAX f32 reference with the original module (eval-mode BN) semantics."""
    x = jnp.transpose(x_nchw, (0, 2, 3, 1))
    dn = ("NHWC", "HWIO", "NHWC")

    def bn(y, g, b, m, v):
        return (y - m) / jnp.sqrt(v + EPS) * g + b

    y = lax.conv_general_dilated(x, params["w1"], (1, 1), "SAME",
                                 dimension_numbers=dn,
                                 precision=lax.Precision.HIGHEST)
    y = jax.nn.relu(bn(y, params["gamma1"], params["beta1"],
                       params["mean1"], params["var1"]))
    y = lax.conv_general_dilated(y, params["w2"], (1, 1), "SAME",
                                 dimension_numbers=dn,
                                 precision=lax.Precision.HIGHEST)
    y = bn(y, params["gamma2"], params["beta2"], params["mean2"], params["var2"])
    y = jax.nn.relu(y + x)
    return jnp.transpose(y, (0, 3, 1, 2))


def residual_block_matched_ref(x_nchw, params):
    """Reference quantized at the same bf16 points as the kernel (tight check
    of the Toeplitz conv / BN fold / residual mechanics)."""
    x = jnp.transpose(x_nchw, (0, 2, 3, 1))
    dn = ("NHWC", "HWIO", "NHWC")

    s1 = params["gamma1"] * lax.rsqrt(params["var1"] + EPS)
    b1 = params["beta1"] - params["mean1"] * s1
    s2 = params["gamma2"] * lax.rsqrt(params["var2"] + EPS)
    b2 = params["beta2"] - params["mean2"] * s2

    q = lambda a: a.astype(jnp.bfloat16).astype(jnp.float32)
    w1e, w2e = q(params["w1"] * s1), q(params["w2"] * s2)
    xb = q(x)

    y1 = jax.nn.relu(lax.conv_general_dilated(
        xb, w1e, (1, 1), "SAME", dimension_numbers=dn,
        precision=lax.Precision.HIGHEST) + b1)
    y2 = lax.conv_general_dilated(
        q(y1), w2e, (1, 1), "SAME", dimension_numbers=dn,
        precision=lax.Precision.HIGHEST) + b2 + xb
    return jnp.transpose(jax.nn.relu(y2), (0, 3, 1, 2))


def make_params(key, cin, cout):
    ks = jax.random.split(key, 8)
    fan1 = 3 * 3 * cin
    fan2 = 3 * 3 * cout
    return {
        "w1": jax.random.normal(ks[0], (3, 3, cin, cout), jnp.float32) * (2.0 / fan1) ** 0.5,
        "w2": jax.random.normal(ks[1], (3, 3, cout, cout), jnp.float32) * (2.0 / fan2) ** 0.5,
        "gamma1": 1.0 + 0.1 * jax.random.normal(ks[2], (cout,), jnp.float32),
        "beta1": 0.1 * jax.random.normal(ks[3], (cout,), jnp.float32),
        "mean1": 0.1 * jax.random.normal(ks[4], (cout,), jnp.float32),
        "var1": jnp.abs(jax.random.normal(ks[5], (cout,), jnp.float32)) + 0.5,
        "gamma2": 1.0 + 0.1 * jax.random.normal(ks[6], (cout,), jnp.float32),
        "beta2": 0.1 * jax.random.normal(ks[7], (cout,), jnp.float32),
        "mean2": jnp.zeros((cout,), jnp.float32),
        "var2": jnp.ones((cout,), jnp.float32),
    }


if __name__ == "__main__":
    key = jax.random.PRNGKey(0)
    k_x, k_p = jax.random.split(key)

    N, C, H, W = 2, 4, 16, 16      # inchannel == outchannel, stride=1, shortcut=None
    x = jax.random.normal(k_x, (N, C, H, W), jnp.float32)
    params = make_params(k_p, C, C)

    # Pack images along the lane axis until the last dim reaches 128 lanes
    # (full vregs, unmasked stores, full MXU columns): W*C = 64 -> pack 2.
    pack = min(N, max(1, 128 // (W * C)))
    while N % pack:
        pack -= 1

    prep = prepare_residual_block(params, W, pack)      # once per weight update
    out = jax.block_until_ready(residual_block_pallas(x, prep, pack=pack))
    assert out.shape == (N, C, H, W)

    # Tight check vs a reference quantized at the same bf16 points.
    ref_m = residual_block_matched_ref(x, params)
    err_m = float(jnp.max(jnp.abs(out - ref_m)))
    assert jnp.allclose(out, ref_m, rtol=2e-3, atol=2e-3), err_m

    # Loose check vs the pure-f32 module semantics (bf16 MXU path).
    ref = residual_block_ref(x, params)
    err = float(jnp.max(jnp.abs(out - ref)))
    assert jnp.allclose(out, ref, rtol=5e-2, atol=5e-2), err

    print("KERNEL_OK")
</pallas_src>

<mosaic_0001>
module attributes {stable_mosaic.version = 11 : i64} {
  func.func @_resblock_kernel(%arg0: i32, %arg1: memref<1x16x128xbf16, #tpu.memory_space<vmem>>, %arg2: memref<384x128xbf16, #tpu.memory_space<vmem>>, %arg3: memref<1x128xf32, #tpu.memory_space<vmem>>, %arg4: memref<384x128xbf16, #tpu.memory_space<vmem>>, %arg5: memref<1x128xf32, #tpu.memory_space<vmem>>, %arg6: memref<1x16x128xf32, #tpu.memory_space<vmem>>) attributes {dimension_semantics = [#tpu.dimension_semantics<arbitrary>], iteration_bounds = array<i64: 1>, scalar_prefetch = 0 : i64, scratch_operands = 0 : i64, tpu.core_type = #tpu.core_type<tc>, window_params = [{transform_indices = @transform_0, window_bounds = array<i64: 1, 16, 128>}, {pipeline_mode = #tpu.pipeline_mode<synchronous>, transform_indices = @transform_1, window_bounds = array<i64: 384, 128>}, {pipeline_mode = #tpu.pipeline_mode<synchronous>, transform_indices = @transform_2, window_bounds = array<i64: 1, 128>}, {pipeline_mode = #tpu.pipeline_mode<synchronous>, transform_indices = @transform_3, window_bounds = array<i64: 384, 128>}, {pipeline_mode = #tpu.pipeline_mode<synchronous>, transform_indices = @transform_4, window_bounds = array<i64: 1, 128>}, {transform_indices = @transform_5, window_bounds = array<i64: 1, 16, 128>}]} {
    %c0 = arith.constant 0 : index
    %c0_0 = arith.constant 0 : index
    %c0_1 = arith.constant 0 : index
    %0 = vector.load %arg1[%c0, %c0_0, %c0_1] : memref<1x16x128xbf16, #tpu.memory_space<vmem>>, vector<1x16x128xbf16>
    %1 = vector.shape_cast %0 : vector<1x16x128xbf16> to vector<16x128xbf16>
    %cst = arith.constant 0.000000e+00 : bf16
    %2 = vector.broadcast %cst : bf16 to vector<1x128xbf16>
    %3 = vector.extract_strided_slice %1 {offsets = [0, 0], sizes = [15, 128], strides = [1, 1]} : vector<16x128xbf16> to vector<15x128xbf16>
    %4 = tpu.concatenate %2, %3 in 0 : vector<1x128xbf16>, vector<15x128xbf16> -> vector<16x128xbf16>
    %5 = vector.extract_strided_slice %1 {offsets = [1, 0], sizes = [15, 128], strides = [1, 1]} : vector<16x128xbf16> to vector<15x128xbf16>
    %6 = tpu.concatenate %5, %2 in 0 : vector<15x128xbf16>, vector<1x128xbf16> -> vector<16x128xbf16>
    %c0_2 = arith.constant 0 : index
    %c0_3 = arith.constant 0 : index
    %7 = vector.load %arg2[%c0_2, %c0_3] : memref<384x128xbf16, #tpu.memory_space<vmem>>, vector<128x128xbf16>
    %cst_4 = arith.constant dense<0.000000e+00> : vector<16x128xf32>
    %8 = tpu.matmul %4, %7, %cst_4 {dimension_numbers = #tpu.dot_dimension_numbers<[1], [0], [0], [1], [0, 0, 1, 1], [], []>} : vector<16x128xbf16>, vector<128x128xbf16>, vector<16x128xf32> -> vector<16x128xf32>
    %c128 = arith.constant 128 : index
    %c0_5 = arith.constant 0 : index
    %9 = vector.load %arg2[%c128, %c0_5] : memref<384x128xbf16, #tpu.memory_space<vmem>>, vector<128x128xbf16>
    %cst_6 = arith.constant dense<0.000000e+00> : vector<16x128xf32>
    %10 = tpu.matmul %1, %9, %cst_6 {dimension_numbers = #tpu.dot_dimension_numbers<[1], [0], [0], [1], [0, 0, 1, 1], [], []>} : vector<16x128xbf16>, vector<128x128xbf16>, vector<16x128xf32> -> vector<16x128xf32>
    %11 = arith.addf %8, %10 : vector<16x128xf32>
    %c256 = arith.constant 256 : index
    %c0_7 = arith.constant 0 : index
    %12 = vector.load %arg2[%c256, %c0_7] : memref<384x128xbf16, #tpu.memory_space<vmem>>, vector<128x128xbf16>
    %cst_8 = arith.constant dense<0.000000e+00> : vector<16x128xf32>
    %13 = tpu.matmul %6, %12, %cst_8 {dimension_numbers = #tpu.dot_dimension_numbers<[1], [0], [0], [1], [0, 0, 1, 1], [], []>} : vector<16x128xbf16>, vector<128x128xbf16>, vector<16x128xf32> -> vector<16x128xf32>
    %14 = arith.addf %11, %13 : vector<16x128xf32>
    %c0_9 = arith.constant 0 : index
    %c0_10 = arith.constant 0 : index
    %15 = vector.load %arg3[%c0_9, %c0_10] : memref<1x128xf32, #tpu.memory_space<vmem>>, vector<1x128xf32>
    %16 = vector.broadcast %15 : vector<1x128xf32> to vector<16x128xf32>
    %17 = arith.addf %14, %16 : vector<16x128xf32>
    %cst_11 = arith.constant 0.000000e+00 : f32
    %18 = vector.broadcast %cst_11 : f32 to vector<16x128xf32>
    %19 = arith.maximumf %17, %18 : vector<16x128xf32>
    %20 = arith.truncf %19 : vector<16x128xf32> to vector<16x128xbf16>
    %cst_12 = arith.constant 0.000000e+00 : bf16
    %21 = vector.broadcast %cst_12 : bf16 to vector<1x128xbf16>
    %22 = vector.extract_strided_slice %20 {offsets = [0, 0], sizes = [15, 128], strides = [1, 1]} : vector<16x128xbf16> to vector<15x128xbf16>
    %23 = tpu.concatenate %21, %22 in 0 : vector<1x128xbf16>, vector<15x128xbf16> -> vector<16x128xbf16>
    %24 = vector.extract_strided_slice %20 {offsets = [1, 0], sizes = [15, 128], strides = [1, 1]} : vector<16x128xbf16> to vector<15x128xbf16>
    %25 = tpu.concatenate %24, %21 in 0 : vector<15x128xbf16>, vector<1x128xbf16> -> vector<16x128xbf16>
    %c0_13 = arith.constant 0 : index
    %c0_14 = arith.constant 0 : index
    %26 = vector.load %arg4[%c0_13, %c0_14] : memref<384x128xbf16, #tpu.memory_space<vmem>>, vector<128x128xbf16>
    %cst_15 = arith.constant dense<0.000000e+00> : vector<16x128xf32>
    %27 = tpu.matmul %23, %26, %cst_15 {dimension_numbers = #tpu.dot_dimension_numbers<[1], [0], [0], [1], [0, 0, 1, 1], [], []>} : vector<16x128xbf16>, vector<128x128xbf16>, vector<16x128xf32> -> vector<16x128xf32>
    %c128_16 = arith.constant 128 : index
    %c0_17 = arith.constant 0 : index
    %28 = vector.load %arg4[%c128_16, %c0_17] : memref<384x128xbf16, #tpu.memory_space<vmem>>, vector<128x128xbf16>
    %cst_18 = arith.constant dense<0.000000e+00> : vector<16x128xf32>
    %29 = tpu.matmul %20, %28, %cst_18 {dimension_numbers = #tpu.dot_dimension_numbers<[1], [0], [0], [1], [0, 0, 1, 1], [], []>} : vector<16x128xbf16>, vector<128x128xbf16>, vector<16x128xf32> -> vector<16x128xf32>
    %30 = arith.addf %27, %29 : vector<16x128xf32>
    %c256_19 = arith.constant 256 : index
    %c0_20 = arith.constant 0 : index
    %31 = vector.load %arg4[%c256_19, %c0_20] : memref<384x128xbf16, #tpu.memory_space<vmem>>, vector<128x128xbf16>
    %cst_21 = arith.constant dense<0.000000e+00> : vector<16x128xf32>
    %32 = tpu.matmul %25, %31, %cst_21 {dimension_numbers = #tpu.dot_dimension_numbers<[1], [0], [0], [1], [0, 0, 1, 1], [], []>} : vector<16x128xbf16>, vector<128x128xbf16>, vector<16x128xf32> -> vector<16x128xf32>
    %33 = arith.addf %30, %32 : vector<16x128xf32>
    %c0_22 = arith.constant 0 : index
    %c0_23 = arith.constant 0 : index
    %34 = vector.load %arg5[%c0_22, %c0_23] : memref<1x128xf32, #tpu.memory_space<vmem>>, vector<1x128xf32>
    %35 = vector.broadcast %34 : vector<1x128xf32> to vector<16x128xf32>
    %36 = arith.addf %33, %35 : vector<16x128xf32>
    %37 = arith.extf %1 : vector<16x128xbf16> to vector<16x128xf32>
    %38 = arith.addf %36, %37 : vector<16x128xf32>
    %cst_24 = arith.constant 0.000000e+00 : f32
    %39 = vector.broadcast %cst_24 : f32 to vector<16x128xf32>
    %40 = arith.maximumf %38, %39 : vector<16x128xf32>
    %c0_25 = arith.constant 0 : index
    %c0_26 = arith.constant 0 : index
    %c0_27 = arith.constant 0 : index
    %41 = vector.load %arg6[%c0_25, %c0_26, %c0_27] : memref<1x16x128xf32, #tpu.memory_space<vmem>>, vector<1x16x128xf32>
    %42 = vector.shape_cast %41 : vector<1x16x128xf32> to vector<16x128xf32>
    %43 = vector.shape_cast %40 : vector<16x128xf32> to vector<1x16x128xf32>
    tpu.vector_store %arg6[%c0_25, %c0_26, %c0_27], %43 {strides = array<i32>} : memref<1x16x128xf32, #tpu.memory_space<vmem>>, vector<1x16x128xf32>,
    return
  }
  func.func @transform_0(%arg0: i32) -> (i32, i32, i32) {
    %c0_i32 = arith.constant 0 : i32
    %c0_i32_0 = arith.constant 0 : i32
    %c0_i32_1 = arith.constant 0 : i32
    return %arg0, %c0_i32, %c0_i32_0 : i32, i32, i32
  }
  func.func @transform_1(%arg0: i32) -> (i32, i32) {
    %c0_i32 = arith.constant 0 : i32
    %c0_i32_0 = arith.constant 0 : i32
    %c0_i32_1 = arith.constant 0 : i32
    return %c0_i32, %c0_i32_0 : i32, i32
  }
  func.func @transform_2(%arg0: i32) -> (i32, i32) {
    %c0_i32 = arith.constant 0 : i32
    %c0_i32_0 = arith.constant 0 : i32
    %c0_i32_1 = arith.constant 0 : i32
    return %c0_i32, %c0_i32_0 : i32, i32
  }
  func.func @transform_3(%arg0: i32) -> (i32, i32) {
    %c0_i32 = arith.constant 0 : i32
    %c0_i32_0 = arith.constant 0 : i32
    %c0_i32_1 = arith.constant 0 : i32
    return %c0_i32, %c0_i32_0 : i32, i32
  }
  func.func @transform_4(%arg0: i32) -> (i32, i32) {
    %c0_i32 = arith.constant 0 : i32
    %c0_i32_0 = arith.constant 0 : i32
    %c0_i32_1 = arith.constant 0 : i32
    return %c0_i32, %c0_i32_0 : i32, i32
  }
  func.func @transform_5(%arg0: i32) -> (i32, i32, i32) {
    %c0_i32 = arith.constant 0 : i32
    %c0_i32_0 = arith.constant 0 : i32
    %c0_i32_1 = arith.constant 0 : i32
    return %arg0, %c0_i32, %c0_i32_0 : i32, i32, i32
  }
}

</mosaic_0001>

<bundles_post_ra>
// kernel: residual_block_pallas.1
= control target key start
LH: loop header
LB: loop body
LE: loop exit
PB: predicated region body
PF: predicated region fallthrough
CT: control target
= control target key end

     0   :  { %v1005_v0 = vmov 0.0   ;;  %vm1006_vm0 = vmmov 0   ;;  %vm36_vm1 = vcmask 1040384   ;;  %vm37_vm2 = vsmask.f32 256  ;;  %s1279_s1 = inlined_call_operand.vmem [shape: bf16[384,128], index: 1, kind: input, shape index: {}]   ;;  %s1280_s0 = inlined_call_operand.vmem [shape: bf16[1,16,128], index: 0, kind: input, shape index: {}]   ;;  %s1281_s3 = inlined_call_operand.vmem [shape: bf16[384,128], index: 3, kind: input, shape index: {}]   ;;  %s1282_s2 = inlined_call_operand.vmem [shape: f32[1,128], index: 2, kind: input, shape index: {}]   ;;  %s1283_s4 = inlined_call_operand.vmem [shape: f32[1,128], index: 4, kind: input, shape index: {}]   ;;  %s1284_s5 = inlined_call_operand.vmem [shape: f32[1,16,128], index: 5, kind: output, shape index: {}]  }
   0x1   :  { %833 = vmatprep.subr.bf16.mxu0 %v1005_v0  ;;  %853 = vmatprep.subr.bf16.mxu1 %v1005_v0  ;;  %v955_v1 = vld [vmem:[%s1279_s1 + $0x40] sm:$0xff]   ;;  %v957_v3 = vld [vmem:[%s1279_s1 + $0x48] sm:$0xff]   ;;  %v959_v5 = vld [vmem:[%s1279_s1 + $0x50] sm:$0xff]   ;;  %vm43_vm4 = vcmask 1047552   ;;  %vm44_vm5 = vsmask.f32 7424 }
   0x2   :  { %v956_v2 = vld [vmem:[%s1279_s1] sm:$0xff]   ;;  %849 = vmatprep.mubr.msk.bf16.mxu0 %vm1006_vm0, %v1005_v0  ;;  %869 = vmatprep.mubr.msk.bf16.mxu1 %vm1006_vm0, %v1005_v0  ;;  %v958_v4 = vld [vmem:[%s1279_s1 + $0x8] sm:$0xff]   ;;  %v960_v6 = vld [vmem:[%s1279_s1 + $0x10] sm:$0xff]  }
   0x3   :  { %834 = vmatpush3.bf16.msra.mxu0 %v955_v1  ;;  %854 = vmatpush3.bf16.msra.mxu1 %v956_v2  ;;  %v961_v7 = vld [vmem:[%s1279_s1 + $0x58] sm:$0xff]   ;;  %v963_v9 = vld [vmem:[%s1279_s1 + $0x60] sm:$0xff]   ;;  %v965_v12 = vld [vmem:[%s1279_s1 + $0x68] sm:$0xff]  }
   0x4   :  { %835 = vmatprep.subr.bf16.mxu0 %v1005_v0  ;;  %855 = vmatprep.subr.bf16.mxu1 %v1005_v0  ;;  %v962_v8 = vld [vmem:[%s1279_s1 + $0x18] sm:$0xff]   ;;  %v964_v10 = vld [vmem:[%s1279_s1 + $0x20] sm:$0xff]   ;;  %v966_v13 = vld [vmem:[%s1279_s1 + $0x28] sm:$0xff]  }
   0x5   :  { %v1084_v11 = vld [vmem:[%s1280_s0] sm:$0xff]   ;;  %v967_v15 = vld [vmem:[%s1279_s1 + $0x70] sm:$0xff]   ;;  %v969_v19 = vld [vmem:[%s1279_s1 + $0x78] sm:$0xff]  }
   0x6   :  { %v29_v14 = vshrl.u32 %v1084_v11, 16  ;;  %v968_v16 = vld [vmem:[%s1279_s1 + $0x30] sm:$0xff]   ;;  %v32_v18 = vshll.u32 %v1084_v11, 16  ;;  %v970_v20 = vld [vmem:[%s1279_s1 + $0x38] sm:$0xff]   ;;  %vm1112_vm3 = vmand %vm36_vm1, %vm37_vm2 }
   0x7   :  { %836 = vmatpush3.bf16.msra.mxu0 %v957_v3  ;;  %856 = vmatpush3.bf16.msra.mxu1 %v958_v4  ;;  %v972_v23 = vld [vmem:[%s1279_s1 + $0x80] sm:$0xff]   ;;  %v973_v25 = vld [vmem:[%s1279_s1 + $0x88] sm:$0xff]   ;;  %v974_v26 = vld [vmem:[%s1279_s1 + $0x90] sm:$0xff]  }
   0x8   :  { %837 = vmatprep.subr.bf16.mxu0 %v1005_v0  ;;  %857 = vmatprep.subr.bf16.mxu1 %v1005_v0  ;;  %v31_v17 = vrot.slane %v29_v14, 7  ;;  %v975_v27 = vld [vmem:[%s1279_s1 + $0x98] sm:$0xff]   ;;  %v976_v28 = vld [vmem:[%s1279_s1 + $0xa0] sm:$0xff]   ;;  %v977_v29 = vld [vmem:[%s1279_s1 + $0xa8] sm:$0xff]   ;;  %v40_v31 = vrot.slane %v32_v18, 1 }
   0x9   :  { %v978_v30 = vld [vmem:[%s1279_s1 + $0xb0] sm:$0xff]   ;;  %v979_v32 = vld [vmem:[%s1279_s1 + $0xb8] sm:$0xff]   ;;  %vm1156_vm6 = vmand %vm43_vm4, %vm44_vm5 }
   0xa   :  { %v34_v21 = vor.u32 %v32_v18, %v31_v17  ;;  %v41_v33 = vor.u32 %v40_v31, %v29_v14  ;;  %v980_v36 = vld [vmem:[%s1281_s3 + $0x40] sm:$0xff]   ;;  %v981_v37 = vld [vmem:[%s1281_s3 + $0x48] sm:$0xff]   ;;  %v982_v40 = vld [vmem:[%s1281_s3 + $0x50] sm:$0xff]  }
   0xb   :  { %838 = vmatpush3.bf16.msra.mxu0 %v959_v5  ;;  %858 = vmatpush3.bf16.msra.mxu1 %v960_v6  ;;  %v983_v38 = vld [vmem:[%s1281_s3] sm:$0xff]   ;;  %v985_v39 = vld [vmem:[%s1281_s3 + $0x8] sm:$0xff]   ;;  %v984_v41 = vld [vmem:[%s1281_s3 + $0x58] sm:$0xff]  }
   0xc   :  { %839 = vmatprep.subr.bf16.mxu0 %v1005_v0  ;;  %859 = vmatprep.subr.bf16.mxu1 %v1005_v0  ;;  %v39_v24 = vsel %vm1112_vm3, 0, %v34_v21  ;;  %v46_v35 = vsel %vm1156_vm6, %v41_v33, 0  ;;  %v987_v42 = vld [vmem:[%s1281_s3 + $0x10] sm:$0xff]   ;;  %v989_v43 = vld [vmem:[%s1281_s3 + $0x18] sm:$0xff]   ;;  %v986_v44 = vld [vmem:[%s1281_s3 + $0x60] sm:$0xff]  }
   0xd   :  { %v988_v45 = vld [vmem:[%s1281_s3 + $0x68] sm:$0xff]   ;;  %v990_v46 = vld [vmem:[%s1281_s3 + $0x70] sm:$0xff]   ;;  %v991_v47 = vld [vmem:[%s1281_s3 + $0x20] sm:$0xff]  }
   0xe   :  { %v992_v48 = vld [vmem:[%s1281_s3 + $0x78] sm:$0xff]   ;;  %v993_v49 = vld [vmem:[%s1281_s3 + $0x28] sm:$0xff]   ;;  %v994_v50 = vld [vmem:[%s1281_s3 + $0x30] sm:$0xff]  }
   0xf   :  { %840 = vmatpush3.bf16.msra.mxu0 %v961_v7  ;;  %860 = vmatpush3.bf16.msra.mxu1 %v962_v8  ;;  %v996_v51 = vld [vmem:[%s1281_s3 + $0x38] sm:$0xff]   ;;  %v753_v63 = vld [vmem:[%s1282_s2] ss:$0 sm:$0xff]  ;;  %v997_v14 = vld [vmem:[%s1281_s3 + $0x88] sm:$0xff]  }
  0x10   :  { %841 = vmatprep.subr.bf16.mxu0 %v1005_v0  ;;  %861 = vmatprep.subr.bf16.mxu1 %v1005_v0  ;;  %v998_v18 = vld [vmem:[%s1281_s3 + $0x90] sm:$0xff]   ;;  %v1000_v21 = vld [vmem:[%s1281_s3 + $0xa0] sm:$0xff]   ;;  %v1001_v22 = vld [vmem:[%s1281_s3 + $0xa8] sm:$0xff]  }
  0x13   :  { %842 = vmatpush3.bf16.msra.mxu0 %v963_v9  ;;  %862 = vmatpush3.bf16.msra.mxu1 %v964_v10  ;;  %v995_v10 = vld [vmem:[%s1281_s3 + $0x80] sm:$0xff]  }
  0x14   :  { %843 = vmatprep.subr.bf16.mxu0 %v1005_v0  ;;  %863 = vmatprep.subr.bf16.mxu1 %v1005_v0 }
  0x17   :  { %844 = vmatpush3.bf16.msra.mxu0 %v965_v12  ;;  %864 = vmatpush3.bf16.msra.mxu1 %v966_v13 }
  0x18   :  { %845 = vmatprep.subr.bf16.mxu0 %v1005_v0  ;;  %865 = vmatprep.subr.bf16.mxu1 %v1005_v0 }
  0x1b   :  { %846 = vmatpush3.bf16.msra.mxu0 %v967_v15  ;;  %866 = vmatpush3.bf16.msra.mxu1 %v968_v16 }
  0x1c   :  { %847 = vmatprep.subr.bf16.mxu0 %v1005_v0  ;;  %867 = vmatprep.subr.bf16.mxu1 %v1005_v0 }
  0x1f   :  { %848 = vmatpush3.bf16.msra.mxu0 %v969_v19  ;;  %868 = vmatpush3.bf16.msra.mxu1 %v970_v20  ;;  %v999_v20 = vld [vmem:[%s1281_s3 + $0x98] sm:$0xff]  }
  0x20   :  { %873 = vmatprep.subr.bf16.mxu0 %v1005_v0  ;;  %893 = vmatprep.subr.bf16.mxu1 %v1005_v0 }
  0x22   :  { %850 = vmatmul.mubr.bf16.vlgmr.msra.gmra.mrb[0].mxu0 %v1084_v11  ;;  %870 = vmatmul.mubr.bf16.vlgmr.msra.gmra.mrb[0].mxu1 %v39_v24 }
  0x23   :  { %874 = vmatpush3.bf16.msra.mxu0 %v972_v23  ;;  %889 = vmatprep.mubr.msk.bf16.mxu0 %vm1006_vm0, %v1005_v0  ;;  %v1002_v23 = vld [vmem:[%s1281_s3 + $0xb0] sm:$0xff]  }
  0x24   :  { %875 = vmatprep.subr.bf16.mxu0 %v1005_v0  ;;  %909 = vmatprep.mubr.msk.bf16.mxu1 %vm1006_vm0, %v1005_v0 }
  0x25   :  { %894 = vmatpush3.bf16.msra.mxu1 %v980_v36 }
  0x26   :  { %895 = vmatprep.subr.bf16.mxu1 %v1005_v0 }
  0x27   :  { %876 = vmatpush3.bf16.msra.mxu0 %v973_v25  ;;  %v1003_v25 = vld [vmem:[%s1281_s3 + $0xb8] sm:$0xff]  }
  0x28   :  { %877 = vmatprep.subr.bf16.mxu0 %v1005_v0 }
  0x29   :  { %896 = vmatpush3.bf16.msra.mxu1 %v981_v37 }
  0x2a   :  { %897 = vmatprep.subr.bf16.mxu1 %v1005_v0 }
  0x2b   :  { %878 = vmatpush3.bf16.msra.mxu0 %v974_v26 }
  0x2c   :  { %879 = vmatprep.subr.bf16.mxu0 %v1005_v0 }
  0x2d   :  { %898 = vmatpush3.bf16.msra.mxu1 %v982_v40  ;;  %v716_v40 = vunpack.c.l.bf16 %v1084_v11 }
  0x2e   :  { %899 = vmatprep.subr.bf16.mxu1 %v1005_v0 }
  0x2f   :  { %880 = vmatpush3.bf16.msra.mxu0 %v975_v27 }
  0x30   :  { %881 = vmatprep.subr.bf16.mxu0 %v1005_v0 }
  0x31   :  { %900 = vmatpush3.bf16.msra.mxu1 %v984_v41 }
  0x32   :  { %901 = vmatprep.subr.bf16.mxu1 %v1005_v0 }
  0x33   :  { %882 = vmatpush3.bf16.msra.mxu0 %v976_v28 }
  0x34   :  { %883 = vmatprep.subr.bf16.mxu0 %v1005_v0 }
  0x35   :  { %902 = vmatpush3.bf16.msra.mxu1 %v986_v44 }
  0x36   :  { %903 = vmatprep.subr.bf16.mxu1 %v1005_v0 }
  0x37   :  { %884 = vmatpush3.bf16.msra.mxu0 %v977_v29 }
  0x38   :  { %885 = vmatprep.subr.bf16.mxu0 %v1005_v0 }
  0x39   :  { %904 = vmatpush3.bf16.msra.mxu1 %v988_v45 }
  0x3a   :  { %905 = vmatprep.subr.bf16.mxu1 %v1005_v0 }
  0x3b   :  { %886 = vmatpush3.bf16.msra.mxu0 %v978_v30 }
  0x3c   :  { %887 = vmatprep.subr.bf16.mxu0 %v1005_v0 }
  0x3d   :  { %906 = vmatpush3.bf16.msra.mxu1 %v990_v46 }
  0x3e   :  { %907 = vmatprep.subr.bf16.mxu1 %v1005_v0 }
  0x3f   :  { %888 = vmatpush3.bf16.msra.mxu0 %v979_v32 }
  0x40   :  { %913 = vmatprep.subr.bf16.mxu0 %v1005_v0 }
  0x41   :  { %908 = vmatpush3.bf16.msra.mxu1 %v992_v48 }
  0x42   :  { %890 = vmatmul.mubr.bf16.vlgmr.msra.gmra.mrb[4].mxu0 %v46_v35  ;;  %933 = vmatprep.subr.bf16.mxu1 %v1005_v0 }
  0x43   :  { %929 = vmatprep.mubr.msk.bf16.mxu0 %vm1006_vm0, %v1005_v0  ;;  %914 = vmatpush3.bf16.msra.mxu0 %v983_v38 }
  0x44   :  { %915 = vmatprep.subr.bf16.mxu0 %v1005_v0 }
  0x47   :  { %916 = vmatpush3.bf16.msra.mxu0 %v985_v39 }
  0x48   :  { %917 = vmatprep.subr.bf16.mxu0 %v1005_v0 }
  0x4b   :  { %918 = vmatpush3.bf16.msra.mxu0 %v987_v42 }
  0x4c   :  { %919 = vmatprep.subr.bf16.mxu0 %v1005_v0 }
  0x4f   :  { %920 = vmatpush3.bf16.msra.mxu0 %v989_v43  ;;  %v717_v43 = vunpack.c.h.bf16 %v1084_v11 }
  0x50   :  { %921 = vmatprep.subr.bf16.mxu0 %v1005_v0 }
  0x53   :  { %922 = vmatpush3.bf16.msra.mxu0 %v991_v47 }
  0x54   :  { %923 = vmatprep.subr.bf16.mxu0 %v1005_v0 }
  0x57   :  { %924 = vmatpush3.bf16.msra.mxu0 %v993_v49 }
  0x58   :  { %925 = vmatprep.subr.bf16.mxu0 %v1005_v0 }
  0x5b   :  { %926 = vmatpush3.bf16.msra.mxu0 %v994_v50 }
  0x5c   :  { %927 = vmatprep.subr.bf16.mxu0 %v1005_v0 }
  0x5f   :  { %928 = vmatpush3.bf16.msra.mxu0 %v996_v51 }
  0xf5   :  { %v162_v52 = vpop.f32.mrb[0].mxu0  ;;  %v251_v53 = vpop.f32.mrb[0].mxu1 }
  0xf6   :  { %v851_v54 = vpop.f32.mrb[1].mxu0  ;;  %v252_v55 = vadd.f32 %v251_v53, %v162_v52  ;;  %v871_v56 = vpop.f32.mrb[1].mxu1 }
  0xf7   :  { %v165_v57 = vpop.f32.mrb[2].mxu0  ;;  %v254_v58 = vpop.f32.mrb[2].mxu1 }
  0xf8   :  { %v852_v59 = vpop.f32.mrb[3].mxu0  ;;  %v255_v60 = vadd.f32 %v254_v58, %v165_v57  ;;  %v872_v61 = vpop.f32.mrb[3].mxu1 }
 0x115   :  { %v356_v62 = vpop.f32.mrb[4].mxu0 }
 0x116   :  { %v363_v1 = vadd.f32 %v356_v62, %v252_v55  ;;  %v891_v2 = vpop.f32.mrb[5].mxu0 }
 0x117   :  { %v359_v3 = vpop.f32.mrb[6].mxu0 }
 0x118   :  { %v372_v4 = vadd.f32 %v753_v63, %v363_v1  ;;  %v364_v5 = vadd.f32 %v359_v3, %v255_v60  ;;  %v892_v6 = vpop.f32.mrb[7].mxu0 }
 0x11a   :  { %v373_v7 = vadd.f32 %v753_v63, %v364_v5  ;;  %v374_v8 = vmax.f32 %v372_v4, 0.0 }
 0x11c   :  { %v375_v9 = vmax.f32 %v373_v7, 0.0 }
 0x11e   :  { %v376_v12 = vpack.c.bf16 %v375_v9, %v374_v8 }
 0x120   :  { %910 = vmatmul.mubr.bf16.vlgmr.msra.gmra.mrb[4].mxu1 %v376_v12  ;;  %v378_v13 = vshrl.u32 %v376_v12, 16  ;;  %v381_v16 = vshll.u32 %v376_v12, 16 }
 0x121   :  { %934 = vmatpush3.bf16.msra.mxu1 %v995_v10  ;;  %949 = vmatprep.mubr.msk.bf16.mxu1 %vm1006_vm0, %v1005_v0 }
 0x122   :  { %935 = vmatprep.subr.bf16.mxu1 %v1005_v0  ;;  %v380_v15 = vrot.slane %v378_v13, 7  ;;  %v386_v24 = vrot.slane %v381_v16, 1 }
 0x124   :  { %v383_v17 = vor.u32 %v381_v16, %v380_v15  ;;  %v387_v26 = vor.u32 %v386_v24, %v378_v13 }
 0x125   :  { %936 = vmatpush3.bf16.msra.mxu1 %v997_v14 }
 0x126   :  { %v385_v19 = vsel %vm1112_vm3, 0, %v383_v17  ;;  %937 = vmatprep.subr.bf16.mxu1 %v1005_v0  ;;  %v389_v27 = vsel %vm1156_vm6, %v387_v26, 0 }
 0x127   :  { %930 = vmatmul.mubr.bf16.vlgmr.msra.gmra.mrb[8].mxu0 %v385_v19 }
 0x129   :  { %938 = vmatpush3.bf16.msra.mxu1 %v998_v18 }
 0x12a   :  { %939 = vmatprep.subr.bf16.mxu1 %v1005_v0 }
 0x12d   :  { %940 = vmatpush3.bf16.msra.mxu1 %v999_v20 }
 0x12e   :  { %941 = vmatprep.subr.bf16.mxu1 %v1005_v0 }
 0x131   :  { %942 = vmatpush3.bf16.msra.mxu1 %v1000_v21 }
 0x132   :  { %943 = vmatprep.subr.bf16.mxu1 %v1005_v0 }
 0x135   :  { %944 = vmatpush3.bf16.msra.mxu1 %v1001_v22 }
 0x136   :  { %945 = vmatprep.subr.bf16.mxu1 %v1005_v0 }
 0x139   :  { %946 = vmatpush3.bf16.msra.mxu1 %v1002_v23 }
 0x13a   :  { %947 = vmatprep.subr.bf16.mxu1 %v1005_v0  ;;  %v778_v0 = vld [vmem:[%s1283_s4] ss:$0 sm:$0xff] }
 0x13d   :  { %948 = vmatpush3.bf16.msra.mxu1 %v1003_v25 }
 0x140   :  { %950 = vmatmul.mubr.bf16.vlgmr.msra.gmra.mrb[8].mxu1 %v389_v27 }
 0x1f3   :  { %v504_v28 = vpop.f32.mrb[4].mxu1 }
 0x1f4   :  { %v911_v29 = vpop.f32.mrb[5].mxu1 }
 0x1f5   :  { %v507_v30 = vpop.f32.mrb[6].mxu1 }
 0x1f6   :  { %v912_v31 = vpop.f32.mrb[7].mxu1 }
 0x1fa   :  { %v593_v32 = vpop.f32.mrb[8].mxu0 }
 0x1fb   :  { %v594_v33 = vadd.f32 %v593_v32, %v504_v28  ;;  %v931_v35 = vpop.f32.mrb[9].mxu0 }
 0x1fc   :  { %v596_v36 = vpop.f32.mrb[10].mxu0 }
 0x1fd   :  { %v597_v37 = vadd.f32 %v596_v36, %v507_v30  ;;  %v932_v38 = vpop.f32.mrb[11].mxu0 }
 0x213   :  { %v698_v39 = vpop.f32.mrb[8].mxu1 }
 0x214   :  { %v705_v34 = vadd.f32 %v698_v39, %v594_v33  ;;  %v951_v41 = vpop.f32.mrb[9].mxu1 }
 0x215   :  { %v701_v42 = vpop.f32.mrb[10].mxu1 }
 0x216   :  { %v714_v44 = vadd.f32 %v778_v0, %v705_v34  ;;  %v706_v45 = vadd.f32 %v701_v42, %v597_v37  ;;  %v952_v46 = vpop.f32.mrb[11].mxu1 }
 0x218   :  { %v718_v47 = vadd.f32 %v716_v40, %v714_v44  ;;  %v715_v48 = vadd.f32 %v778_v0, %v706_v45 }
 0x21a   :  { %v720_v49 = vmax.f32 %v718_v47, 0.0  ;;  %v719_v50 = vadd.f32 %v717_v43, %v715_v48 }
 0x21c   :  { %722 = vst [vmem:[%s1284_s5] sm:$0xff] %v720_v49  ;;  %v721_v51 = vmax.f32 %v719_v50, 0.0 }
 0x21e   :  { %723 = vst [vmem:[%s1284_s5 + $0x8] sm:$0xff] %v721_v51 }

</bundles_post_ra>
